<compile_context>
chip_gen: v6e
topology: v6e:2x2x1
jax: 0.10.0
libtpu: 0.0.40
codegen_flags: <defaults>
</compile_context>

<pallas_src>
import math

import jax
import jax.numpy as jnp
from jax import lax
from jax.experimental import pallas as pl
from jax.experimental.pallas import tpu as pltpu


# ----------------------------------------------------------------- helpers

_VMEM_LIMIT_CACHE = None


def _vmem_limit_bytes():
    """Generation-aware VMEM cap: ~75% of physical per-TC VMEM, 48 MiB fallback."""
    global _VMEM_LIMIT_CACHE
    if _VMEM_LIMIT_CACHE is None:
        try:
            cap = int(pltpu.get_tpu_info().vmem_capacity_bytes)
            if cap <= 0:
                raise ValueError("bad vmem capacity")
            _VMEM_LIMIT_CACHE = (cap * 3) // 4
        except Exception:  # conservative default that fits every generation
            _VMEM_LIMIT_CACHE = 48 * 1024 * 1024
    return _VMEM_LIMIT_CACHE


def _pick_tile(dim, pref, align):
    """Largest tile <= pref that is either the full dim or a multiple of `align`."""
    if dim <= pref:
        return dim
    return max(align, (pref // align) * align)


# ----------------------------------------------------------- head-major linear

def _linear_kernel(x_ref, w_ref, b_ref, o_ref):
    # x: (tm, Din) f32 -> bf16 cast in-kernel (x is read from HBM once as f32);
    # w: (Din, E) bf16; b: (1, E) f32; o: (tm, E) bf16.  f32 MXU accumulation.
    x = x_ref[...].astype(jnp.bfloat16)
    acc = jnp.dot(x, w_ref[...], preferred_element_type=jnp.float32)
    o_ref[...] = (acc + b_ref[...]).astype(o_ref.dtype)


def pallas_linear_headmajor(x2d, w_hde, b_h1e, *, tm_pref=512):
    """x2d: (M, Din) f32; w_hde: (H, Din, E) bf16; b_h1e: (H, 1, E) f32 -> (H, M, E) bf16."""
    M, Din = x2d.shape
    H, _, E = w_hde.shape
    tm = _pick_tile(M, tm_pref, 16)
    grid = (pl.cdiv(M, tm), H)  # activation block constant across inner head axis
    return pl.pallas_call(
        _linear_kernel,
        out_shape=jax.ShapeDtypeStruct((H, M, E), jnp.bfloat16),
        grid=grid,
        in_specs=[
            pl.BlockSpec((tm, Din), lambda i, h: (i, 0)),        # streamed once per tile
            pl.BlockSpec((None, Din, E), lambda i, h: (h, 0, 0)),  # small bf16 weight tile
            pl.BlockSpec((None, 1, E), lambda i, h: (h, 0, 0)),
        ],
        out_specs=pl.BlockSpec((None, tm, E), lambda i, h: (h, i, 0)),
        compiler_params=pltpu.CompilerParams(
            dimension_semantics=("parallel", "arbitrary"),
            vmem_limit_bytes=_vmem_limit_bytes()),
    )(x2d, w_hde, b_h1e)


# ----------------------------------- fused attention + output projection kernel

def _reprog_out_kernel(q_ref, k_ref, v_ref, wo_ref, bo_ref, o_ref, acc_ref):
    # q: (tbl, E) bf16 (1/sqrt(E) already folded into wq/bq), k/v: (S, E) bf16,
    # wo: (E, d_llm) bf16, bo: (1, d_llm) f32, o: (tbl, d_llm) f32, acc: f32 scratch.
    h = pl.program_id(1)

    @pl.when(h == 0)
    def _():
        acc_ref[...] = jnp.zeros_like(acc_ref)

    q = q_ref[...]
    k = k_ref[...]
    v = v_ref[...]
    # Contract the E axes directly (no k.T relayout); f32 accumulation.
    s = lax.dot_general(q, k, (((1,), (1,)), ((), ())),
                        preferred_element_type=jnp.float32)           # (tbl, S)
    s = s - jnp.max(s, axis=-1, keepdims=True)
    p = jnp.exp(s)
    p = p * pl.reciprocal(jnp.sum(p, axis=-1, keepdims=True), approx=True)
    # TODO(synk): attention_dropout=0.1 is an eval-mode no-op; not implemented.
    oh = jnp.dot(p.astype(v.dtype), v, preferred_element_type=jnp.float32)   # (tbl, E)
    # Fused out_projection: accumulate this head's contribution to (tbl, d_llm).
    acc_ref[...] += jnp.dot(oh.astype(wo_ref.dtype), wo_ref[...],
                            preferred_element_type=jnp.float32)

    @pl.when(h == pl.num_programs(1) - 1)
    def _():
        o_ref[...] = (acc_ref[...] + bo_ref[...]).astype(o_ref.dtype)


def pallas_reprogramming_out(q_hme, k_hse, v_hse, wo_hed, bo_1d, *, tbl_pref=128):
    """q: (H, BL, E), k/v: (H, S, E) bf16; wo: (H, E, d_llm) bf16; bo: (1, d_llm) f32
    -> (BL, d_llm) f32 (attention + out_projection fused, heads as reduction axis)."""
    H, BL, E = q_hme.shape
    S = k_hse.shape[1]
    d_llm = wo_hed.shape[2]
    tbl = _pick_tile(BL, tbl_pref, 16)
    grid = (pl.cdiv(BL, tbl), H)  # head (reduction) axis innermost -> resident output
    return pl.pallas_call(
        _reprog_out_kernel,
        out_shape=jax.ShapeDtypeStruct((BL, d_llm), jnp.float32),
        grid=grid,
        in_specs=[
            pl.BlockSpec((None, tbl, E), lambda i, h: (h, i, 0)),
            pl.BlockSpec((None, S, E), lambda i, h: (h, 0, 0)),
            pl.BlockSpec((None, S, E), lambda i, h: (h, 0, 0)),
            pl.BlockSpec((None, E, d_llm), lambda i, h: (h, 0, 0)),
            pl.BlockSpec((1, d_llm), lambda i, h: (0, 0)),
        ],
        out_specs=pl.BlockSpec((tbl, d_llm), lambda i, h: (i, 0)),
        scratch_shapes=[pltpu.VMEM((tbl, d_llm), jnp.float32)],
        compiler_params=pltpu.CompilerParams(
            dimension_semantics=("parallel", "arbitrary"),
            vmem_limit_bytes=_vmem_limit_bytes()),
    )(q_hme, k_hse, v_hse, wo_hed, bo_1d)


# ------------------------------------------------------------------ forward pass

def reprogramming_layer_forward(kparams, target_embedding, source_embedding,
                                value_embedding, n_heads):
    B, L, d_model = target_embedding.shape
    S, d_llm = source_embedding.shape

    q = pallas_linear_headmajor(target_embedding.reshape(B * L, d_model),
                                kparams["wq"], kparams["bq"])        # (H, B*L, E) bf16
    k = pallas_linear_headmajor(source_embedding,
                                kparams["wk"], kparams["bk"])        # (H, S, E) bf16
    v = pallas_linear_headmajor(value_embedding,
                                kparams["wv"], kparams["bv"])        # (H, S, E) bf16

    y = pallas_reprogramming_out(q, k, v, kparams["wo"], kparams["bo"])  # (B*L, d_llm)
    return y.reshape(B, L, d_llm)


# ------------------------------------------------------------------ params

def init_params(key, d_model, n_heads, d_llm, d_keys=None, dtype=jnp.float32):
    """Raw PyTorch-style f32 params: weight (out_features, in_features), bias (out,)."""
    d_keys = d_keys or d_model // n_heads
    dk = d_keys * n_heads

    def linear_init(k, in_f, out_f):
        bound = 1.0 / math.sqrt(in_f)
        kw, kb = jax.random.split(k)
        w = jax.random.uniform(kw, (out_f, in_f), dtype, -bound, bound)
        b = jax.random.uniform(kb, (out_f,), dtype, -bound, bound)
        return w, b

    k1, k2, k3, k4 = jax.random.split(key, 4)
    wq, bq = linear_init(k1, d_model, dk)
    wk, bk = linear_init(k2, d_llm, dk)
    wv, bv = linear_init(k3, d_llm, dk)
    wo, bo = linear_init(k4, dk, d_llm)
    return dict(wq=wq, bq=bq, wk=wk, bk=bk, wv=wv, bv=bv, wo=wo, bo=bo)


def prepare_kernel_params(raw, n_heads):
    """One-time weight prep: head-major, pre-transposed, bf16, 1/sqrt(E) folded into Q."""
    H = n_heads
    dk, d_model = raw["wq"].shape
    E = dk // H
    d_llm = raw["wk"].shape[1]
    scale = 1.0 / math.sqrt(E)
    bf = jnp.bfloat16

    def head_major(w, b):  # w: (H*E, Din) -> (H, Din, E); b: (H*E,) -> (H, 1, E)
        w_h = jnp.transpose(w.reshape(H, E, -1), (0, 2, 1))
        b_h = b.reshape(H, 1, E)
        return w_h, b_h

    wq_h, bq_h = head_major(raw["wq"] * scale, raw["bq"] * scale)   # scale folded
    wk_h, bk_h = head_major(raw["wk"], raw["bk"])
    wv_h, bv_h = head_major(raw["wv"], raw["bv"])
    wo_h = jnp.transpose(raw["wo"].reshape(d_llm, H, E), (1, 2, 0))  # (H, E, d_llm)
    bo = raw["bo"].reshape(1, d_llm)

    return dict(wq=wq_h.astype(bf), bq=bq_h,         # biases stay f32 (added post-accum)
                wk=wk_h.astype(bf), bk=bk_h,
                wv=wv_h.astype(bf), bv=bv_h,
                wo=wo_h.astype(bf), bo=bo)


# ------------------------------------------------------------------ reference

def reference_forward(raw, target, source, value, n_heads):
    with jax.default_matmul_precision("float32"):
        B, L, _ = target.shape
        S, _ = source.shape
        H = n_heads
        q = (target @ raw["wq"].T + raw["bq"]).reshape(B, L, H, -1)
        k = (source @ raw["wk"].T + raw["bk"]).reshape(S, H, -1)
        v = (value @ raw["wv"].T + raw["bv"]).reshape(S, H, -1)
        E = q.shape[-1]
        scores = jnp.einsum("blhe,she->bhls", q, k)
        A = jax.nn.softmax(scores / math.sqrt(E), axis=-1)
        out = jnp.einsum("bhls,she->blhe", A, v).reshape(B, L, H * E)
        return out @ raw["wo"].T + raw["bo"]


# ------------------------------------------------------------------ main

if __name__ == "__main__":
    d_model, n_heads, d_llm = 32, 4, 64
    B, L, S = 2, 8, 16

    key = jax.random.PRNGKey(0)
    kp, kt, ks, kv = jax.random.split(key, 4)
    raw_params = init_params(kp, d_model, n_heads, d_llm)
    kernel_params = prepare_kernel_params(raw_params, n_heads)

    target_embedding = jax.random.normal(kt, (B, L, d_model), jnp.float32)
    source_embedding = jax.random.normal(ks, (S, d_llm), jnp.float32)
    value_embedding = jax.random.normal(kv, (S, d_llm), jnp.float32)

    fwd = jax.jit(reprogramming_layer_forward, static_argnums=(4,))
    out = fwd(kernel_params, target_embedding, source_embedding,
              value_embedding, n_heads)
    out = jax.block_until_ready(out)

    ref = reference_forward(raw_params, target_embedding, source_embedding,
                            value_embedding, n_heads)
    assert out.shape == (B, L, d_llm), out.shape

    # Relative-error metric: bf16 MXU operands + EUP approximate reciprocal in softmax.
    max_err = float(jnp.max(jnp.abs(out - ref)))
    rel_err = max_err / (float(jnp.max(jnp.abs(ref))) + 1e-6)
    assert rel_err < 3e-2, (max_err, rel_err)

    print("KERNEL_OK")
</pallas_src>

<mosaic_0001>
module attributes {stable_mosaic.version = 11 : i64} {
  func.func @_linear_kernel(%arg0: i32, %arg1: i32, %arg2: memref<16x32xf32, #tpu.memory_space<vmem>>, %arg3: memref<1x32x8xbf16, #tpu.memory_space<vmem>>, %arg4: memref<1x1x8xf32, #tpu.memory_space<vmem>>, %arg5: memref<1x16x8xbf16, #tpu.memory_space<vmem>>) attributes {dimension_semantics = [#tpu.dimension_semantics<parallel>, #tpu.dimension_semantics<arbitrary>], iteration_bounds = array<i64: 1, 4>, scalar_prefetch = 0 : i64, scratch_operands = 0 : i64, tpu.core_type = #tpu.core_type<tc>, window_params = [{transform_indices = @transform_0, window_bounds = array<i64: 16, 32>}, {transform_indices = @transform_1, window_bounds = array<i64: 1, 32, 8>}, {transform_indices = @transform_2, window_bounds = array<i64: 1, 1, 8>}, {transform_indices = @transform_3, window_bounds = array<i64: 1, 16, 8>}]} {
    %c0 = arith.constant 0 : index
    %c0_0 = arith.constant 0 : index
    %0 = vector.load %arg2[%c0, %c0_0] : memref<16x32xf32, #tpu.memory_space<vmem>>, vector<16x32xf32>
    %1 = arith.truncf %0 : vector<16x32xf32> to vector<16x32xbf16>
    %c0_1 = arith.constant 0 : index
    %c0_2 = arith.constant 0 : index
    %c0_3 = arith.constant 0 : index
    %2 = vector.load %arg3[%c0_1, %c0_2, %c0_3] : memref<1x32x8xbf16, #tpu.memory_space<vmem>>, vector<1x32x8xbf16>
    %3 = vector.shape_cast %2 : vector<1x32x8xbf16> to vector<32x8xbf16>
    %cst = arith.constant dense<0.000000e+00> : vector<16x8xf32>
    %4 = tpu.matmul %1, %3, %cst {dimension_numbers = #tpu.dot_dimension_numbers<[1], [0], [0], [1], [0, 0, 1, 1], [], []>} : vector<16x32xbf16>, vector<32x8xbf16>, vector<16x8xf32> -> vector<16x8xf32>
    %c0_4 = arith.constant 0 : index
    %c0_5 = arith.constant 0 : index
    %c0_6 = arith.constant 0 : index
    %5 = vector.load %arg4[%c0_4, %c0_5, %c0_6] : memref<1x1x8xf32, #tpu.memory_space<vmem>>, vector<1x1x8xf32>
    %6 = vector.shape_cast %5 : vector<1x1x8xf32> to vector<1x8xf32>
    %7 = vector.broadcast %6 : vector<1x8xf32> to vector<16x8xf32>
    %8 = arith.addf %4, %7 : vector<16x8xf32>
    %9 = arith.truncf %8 : vector<16x8xf32> to vector<16x8xbf16>
    %c0_7 = arith.constant 0 : index
    %c0_8 = arith.constant 0 : index
    %c0_9 = arith.constant 0 : index
    %10 = vector.load %arg5[%c0_7, %c0_8, %c0_9] : memref<1x16x8xbf16, #tpu.memory_space<vmem>>, vector<1x16x8xbf16>
    %11 = vector.shape_cast %10 : vector<1x16x8xbf16> to vector<16x8xbf16>
    %12 = vector.shape_cast %9 : vector<16x8xbf16> to vector<1x16x8xbf16>
    tpu.vector_store %arg5[%c0_7, %c0_8, %c0_9], %12 {strides = array<i32>} : memref<1x16x8xbf16, #tpu.memory_space<vmem>>, vector<1x16x8xbf16>,
    return
  }
  func.func @transform_0(%arg0: i32, %arg1: i32) -> (i32, i32) {
    %c0_i32 = arith.constant 0 : i32
    %c0_i32_0 = arith.constant 0 : i32
    return %arg0, %c0_i32 : i32, i32
  }
  func.func @transform_1(%arg0: i32, %arg1: i32) -> (i32, i32, i32) {
    %c0_i32 = arith.constant 0 : i32
    %c0_i32_0 = arith.constant 0 : i32
    %c0_i32_1 = arith.constant 0 : i32
    return %arg1, %c0_i32, %c0_i32_0 : i32, i32, i32
  }
  func.func @transform_2(%arg0: i32, %arg1: i32) -> (i32, i32, i32) {
    %c0_i32 = arith.constant 0 : i32
    %c0_i32_0 = arith.constant 0 : i32
    %c0_i32_1 = arith.constant 0 : i32
    return %arg1, %c0_i32, %c0_i32_0 : i32, i32, i32
  }
  func.func @transform_3(%arg0: i32, %arg1: i32) -> (i32, i32, i32) {
    %c0_i32 = arith.constant 0 : i32
    %c0_i32_0 = arith.constant 0 : i32
    return %arg1, %arg0, %c0_i32 : i32, i32, i32
  }
}

module attributes {stable_mosaic.version = 11 : i64} {
  func.func @_linear_kernel(%arg0: i32, %arg1: i32, %arg2: memref<16x64xf32, #tpu.memory_space<vmem>>, %arg3: memref<1x64x8xbf16, #tpu.memory_space<vmem>>, %arg4: memref<1x1x8xf32, #tpu.memory_space<vmem>>, %arg5: memref<1x16x8xbf16, #tpu.memory_space<vmem>>) attributes {dimension_semantics = [#tpu.dimension_semantics<parallel>, #tpu.dimension_semantics<arbitrary>], iteration_bounds = array<i64: 1, 4>, scalar_prefetch = 0 : i64, scratch_operands = 0 : i64, tpu.core_type = #tpu.core_type<tc>, window_params = [{transform_indices = @transform_0, window_bounds = array<i64: 16, 64>}, {transform_indices = @transform_1, window_bounds = array<i64: 1, 64, 8>}, {transform_indices = @transform_2, window_bounds = array<i64: 1, 1, 8>}, {transform_indices = @transform_3, window_bounds = array<i64: 1, 16, 8>}]} {
    %c0 = arith.constant 0 : index
    %c0_0 = arith.constant 0 : index
    %0 = vector.load %arg2[%c0, %c0_0] : memref<16x64xf32, #tpu.memory_space<vmem>>, vector<16x64xf32>
    %1 = arith.truncf %0 : vector<16x64xf32> to vector<16x64xbf16>
    %c0_1 = arith.constant 0 : index
    %c0_2 = arith.constant 0 : index
    %c0_3 = arith.constant 0 : index
    %2 = vector.load %arg3[%c0_1, %c0_2, %c0_3] : memref<1x64x8xbf16, #tpu.memory_space<vmem>>, vector<1x64x8xbf16>
    %3 = vector.shape_cast %2 : vector<1x64x8xbf16> to vector<64x8xbf16>
    %cst = arith.constant dense<0.000000e+00> : vector<16x8xf32>
    %4 = tpu.matmul %1, %3, %cst {dimension_numbers = #tpu.dot_dimension_numbers<[1], [0], [0], [1], [0, 0, 1, 1], [], []>} : vector<16x64xbf16>, vector<64x8xbf16>, vector<16x8xf32> -> vector<16x8xf32>
    %c0_4 = arith.constant 0 : index
    %c0_5 = arith.constant 0 : index
    %c0_6 = arith.constant 0 : index
    %5 = vector.load %arg4[%c0_4, %c0_5, %c0_6] : memref<1x1x8xf32, #tpu.memory_space<vmem>>, vector<1x1x8xf32>
    %6 = vector.shape_cast %5 : vector<1x1x8xf32> to vector<1x8xf32>
    %7 = vector.broadcast %6 : vector<1x8xf32> to vector<16x8xf32>
    %8 = arith.addf %4, %7 : vector<16x8xf32>
    %9 = arith.truncf %8 : vector<16x8xf32> to vector<16x8xbf16>
    %c0_7 = arith.constant 0 : index
    %c0_8 = arith.constant 0 : index
    %c0_9 = arith.constant 0 : index
    %10 = vector.load %arg5[%c0_7, %c0_8, %c0_9] : memref<1x16x8xbf16, #tpu.memory_space<vmem>>, vector<1x16x8xbf16>
    %11 = vector.shape_cast %10 : vector<1x16x8xbf16> to vector<16x8xbf16>
    %12 = vector.shape_cast %9 : vector<16x8xbf16> to vector<1x16x8xbf16>
    tpu.vector_store %arg5[%c0_7, %c0_8, %c0_9], %12 {strides = array<i32>} : memref<1x16x8xbf16, #tpu.memory_space<vmem>>, vector<1x16x8xbf16>,
    return
  }
  func.func @transform_0(%arg0: i32, %arg1: i32) -> (i32, i32) {
    %c0_i32 = arith.constant 0 : i32
    %c0_i32_0 = arith.constant 0 : i32
    return %arg0, %c0_i32 : i32, i32
  }
  func.func @transform_1(%arg0: i32, %arg1: i32) -> (i32, i32, i32) {
    %c0_i32 = arith.constant 0 : i32
    %c0_i32_0 = arith.constant 0 : i32
    %c0_i32_1 = arith.constant 0 : i32
    return %arg1, %c0_i32, %c0_i32_0 : i32, i32, i32
  }
  func.func @transform_2(%arg0: i32, %arg1: i32) -> (i32, i32, i32) {
    %c0_i32 = arith.constant 0 : i32
    %c0_i32_0 = arith.constant 0 : i32
    %c0_i32_1 = arith.constant 0 : i32
    return %arg1, %c0_i32, %c0_i32_0 : i32, i32, i32
  }
  func.func @transform_3(%arg0: i32, %arg1: i32) -> (i32, i32, i32) {
    %c0_i32 = arith.constant 0 : i32
    %c0_i32_0 = arith.constant 0 : i32
    return %arg1, %arg0, %c0_i32 : i32, i32, i32
  }
}

module attributes {stable_mosaic.version = 11 : i64} {
  func.func @_reprog_out_kernel(%arg0: i32, %arg1: i32, %arg2: memref<1x16x8xbf16, #tpu.memory_space<vmem>>, %arg3: memref<1x16x8xbf16, #tpu.memory_space<vmem>>, %arg4: memref<1x16x8xbf16, #tpu.memory_space<vmem>>, %arg5: memref<1x8x64xbf16, #tpu.memory_space<vmem>>, %arg6: memref<1x64xf32, #tpu.memory_space<vmem>>, %arg7: memref<16x64xf32, #tpu.memory_space<vmem>>, %arg8: memref<16x64xf32, #tpu.memory_space<vmem>>) attributes {dimension_semantics = [#tpu.dimension_semantics<parallel>, #tpu.dimension_semantics<arbitrary>], iteration_bounds = array<i64: 1, 4>, scalar_prefetch = 0 : i64, scratch_operands = 1 : i64, tpu.core_type = #tpu.core_type<tc>, window_params = [{transform_indices = @transform_0, window_bounds = array<i64: 1, 16, 8>}, {transform_indices = @transform_1, window_bounds = array<i64: 1, 16, 8>}, {transform_indices = @transform_2, window_bounds = array<i64: 1, 16, 8>}, {transform_indices = @transform_3, window_bounds = array<i64: 1, 8, 64>}, {pipeline_mode = #tpu.pipeline_mode<synchronous>, transform_indices = @transform_4, window_bounds = array<i64: 1, 64>}, {transform_indices = @transform_5, window_bounds = array<i64: 16, 64>}]} {
    %c0_i32 = arith.constant 0 : i32
    %0 = arith.cmpi eq, %arg1, %c0_i32 : i32
    %1 = arith.extui %0 : i1 to i32
    %c0_i32_0 = arith.constant 0 : i32
    %2 = arith.cmpi ne, %1, %c0_i32_0 : i32
    scf.if %2 {
      %cst_21 = arith.constant 0.000000e+00 : f32
      %32 = vector.broadcast %cst_21 : f32 to vector<16x64xf32>
      %c0_22 = arith.constant 0 : index
      %c0_23 = arith.constant 0 : index
      %33 = vector.load %arg8[%c0_22, %c0_23] : memref<16x64xf32, #tpu.memory_space<vmem>>, vector<16x64xf32>
      tpu.vector_store %arg8[%c0_22, %c0_23], %32 {strides = array<i32>} : memref<16x64xf32, #tpu.memory_space<vmem>>, vector<16x64xf32>,
    } else {
    }
    %c0 = arith.constant 0 : index
    %c0_1 = arith.constant 0 : index
    %c0_2 = arith.constant 0 : index
    %3 = vector.load %arg2[%c0, %c0_1, %c0_2] : memref<1x16x8xbf16, #tpu.memory_space<vmem>>, vector<1x16x8xbf16>
    %4 = vector.shape_cast %3 : vector<1x16x8xbf16> to vector<16x8xbf16>
    %c0_3 = arith.constant 0 : index
    %c0_4 = arith.constant 0 : index
    %c0_5 = arith.constant 0 : index
    %5 = vector.load %arg3[%c0_3, %c0_4, %c0_5] : memref<1x16x8xbf16, #tpu.memory_space<vmem>>, vector<1x16x8xbf16>
    %6 = vector.shape_cast %5 : vector<1x16x8xbf16> to vector<16x8xbf16>
    %c0_6 = arith.constant 0 : index
    %c0_7 = arith.constant 0 : index
    %c0_8 = arith.constant 0 : index
    %7 = vector.load %arg4[%c0_6, %c0_7, %c0_8] : memref<1x16x8xbf16, #tpu.memory_space<vmem>>, vector<1x16x8xbf16>
    %8 = vector.shape_cast %7 : vector<1x16x8xbf16> to vector<16x8xbf16>
    %cst = arith.constant dense<0.000000e+00> : vector<16x16xf32>
    %9 = tpu.matmul %4, %6, %cst {dimension_numbers = #tpu.dot_dimension_numbers<[1], [1], [0], [0], [0, 0, 1, 0], [], []>} : vector<16x8xbf16>, vector<16x8xbf16>, vector<16x16xf32> -> vector<16x16xf32>
    %cst_9 = arith.constant dense<0xFF800000> : vector<16xf32>
    %10 = vector.multi_reduction <maximumf>, %9, %cst_9 [1] : vector<16x16xf32> to vector<16xf32>
    %11 = vector.shape_cast %10 : vector<16xf32> to vector<16x1xf32>
    %12 = vector.broadcast %11 : vector<16x1xf32> to vector<16x16xf32>
    %13 = arith.subf %9, %12 : vector<16x16xf32>
    %14 = math.exp %13 : vector<16x16xf32>
    %cst_10 = arith.constant dense<0.000000e+00> : vector<16xf32>
    %15 = vector.multi_reduction <add>, %14, %cst_10 [1] : vector<16x16xf32> to vector<16xf32>
    %16 = vector.shape_cast %15 : vector<16xf32> to vector<16x1xf32>
    %17 = tpu.reciprocal %16 {approx = true} : vector<16x1xf32> -> vector<16x1xf32>
    %18 = vector.broadcast %17 : vector<16x1xf32> to vector<16x16xf32>
    %19 = arith.mulf %14, %18 : vector<16x16xf32>
    %20 = arith.truncf %19 : vector<16x16xf32> to vector<16x16xbf16>
    %cst_11 = arith.constant dense<0.000000e+00> : vector<16x8xf32>
    %21 = tpu.matmul %20, %8, %cst_11 {dimension_numbers = #tpu.dot_dimension_numbers<[1], [0], [0], [1], [0, 0, 1, 1], [], []>} : vector<16x16xbf16>, vector<16x8xbf16>, vector<16x8xf32> -> vector<16x8xf32>
    %c0_12 = arith.constant 0 : index
    %c0_13 = arith.constant 0 : index
    %22 = vector.load %arg8[%c0_12, %c0_13] : memref<16x64xf32, #tpu.memory_space<vmem>>, vector<16x64xf32>
    %23 = arith.truncf %21 : vector<16x8xf32> to vector<16x8xbf16>
    %c0_14 = arith.constant 0 : index
    %c0_15 = arith.constant 0 : index
    %c0_16 = arith.constant 0 : index
    %24 = vector.load %arg5[%c0_14, %c0_15, %c0_16] : memref<1x8x64xbf16, #tpu.memory_space<vmem>>, vector<1x8x64xbf16>
    %25 = vector.shape_cast %24 : vector<1x8x64xbf16> to vector<8x64xbf16>
    %cst_17 = arith.constant dense<0.000000e+00> : vector<16x64xf32>
    %26 = tpu.matmul %23, %25, %cst_17 {dimension_numbers = #tpu.dot_dimension_numbers<[1], [0], [0], [1], [0, 0, 1, 1], [], []>} : vector<16x8xbf16>, vector<8x64xbf16>, vector<16x64xf32> -> vector<16x64xf32>
    %27 = arith.addf %22, %26 : vector<16x64xf32>
    %c0_18 = arith.constant 0 : index
    %c0_19 = arith.constant 0 : index
    %28 = vector.load %arg8[%c0_18, %c0_19] : memref<16x64xf32, #tpu.memory_space<vmem>>, vector<16x64xf32>
    tpu.vector_store %arg8[%c0_18, %c0_19], %27 {strides = array<i32>} : memref<16x64xf32, #tpu.memory_space<vmem>>, vector<16x64xf32>,
    %c3_i32 = arith.constant 3 : i32
    %29 = arith.cmpi eq, %arg1, %c3_i32 : i32
    %30 = arith.extui %29 : i1 to i32
    %c0_i32_20 = arith.constant 0 : i32
    %31 = arith.cmpi ne, %30, %c0_i32_20 : i32
    scf.if %31 {
      %c0_21 = arith.constant 0 : index
      %c0_22 = arith.constant 0 : index
      %32 = vector.load %arg8[%c0_21, %c0_22] : memref<16x64xf32, #tpu.memory_space<vmem>>, vector<16x64xf32>
      %c0_23 = arith.constant 0 : index
      %c0_24 = arith.constant 0 : index
      %33 = vector.load %arg6[%c0_23, %c0_24] : memref<1x64xf32, #tpu.memory_space<vmem>>, vector<1x64xf32>
      %34 = vector.broadcast %33 : vector<1x64xf32> to vector<16x64xf32>
      %35 = arith.addf %32, %34 : vector<16x64xf32>
      %c0_25 = arith.constant 0 : index
      %c0_26 = arith.constant 0 : index
      %36 = vector.load %arg7[%c0_25, %c0_26] : memref<16x64xf32, #tpu.memory_space<vmem>>, vector<16x64xf32>
      tpu.vector_store %arg7[%c0_25, %c0_26], %35 {strides = array<i32>} : memref<16x64xf32, #tpu.memory_space<vmem>>, vector<16x64xf32>,
    } else {
    }
    return
  }
  func.func @transform_0(%arg0: i32, %arg1: i32) -> (i32, i32, i32) {
    %c0_i32 = arith.constant 0 : i32
    %c0_i32_0 = arith.constant 0 : i32
    return %arg1, %arg0, %c0_i32 : i32, i32, i32
  }
  func.func @transform_1(%arg0: i32, %arg1: i32) -> (i32, i32, i32) {
    %c0_i32 = arith.constant 0 : i32
    %c0_i32_0 = arith.constant 0 : i32
    %c0_i32_1 = arith.constant 0 : i32
    return %arg1, %c0_i32, %c0_i32_0 : i32, i32, i32
  }
  func.func @transform_2(%arg0: i32, %arg1: i32) -> (i32, i32, i32) {
    %c0_i32 = arith.constant 0 : i32
    %c0_i32_0 = arith.constant 0 : i32
    %c0_i32_1 = arith.constant 0 : i32
    return %arg1, %c0_i32, %c0_i32_0 : i32, i32, i32
  }
  func.func @transform_3(%arg0: i32, %arg1: i32) -> (i32, i32, i32) {
    %c0_i32 = arith.constant 0 : i32
    %c0_i32_0 = arith.constant 0 : i32
    %c0_i32_1 = arith.constant 0 : i32
    return %arg1, %c0_i32, %c0_i32_0 : i32, i32, i32
  }
  func.func @transform_4(%arg0: i32, %arg1: i32) -> (i32, i32) {
    %c0_i32 = arith.constant 0 : i32
    %c0_i32_0 = arith.constant 0 : i32
    %c0_i32_1 = arith.constant 0 : i32
    return %c0_i32, %c0_i32_0 : i32, i32
  }
  func.func @transform_5(%arg0: i32, %arg1: i32) -> (i32, i32) {
    %c0_i32 = arith.constant 0 : i32
    %c0_i32_0 = arith.constant 0 : i32
    return %arg0, %c0_i32 : i32, i32
  }
}

</mosaic_0001>

<bundles_post_ra>
// kernel: reprogramming_layer_forward.4
= control target key start
LH: loop header
LB: loop body
LE: loop exit
PB: predicated region body
PF: predicated region fallthrough
CT: control target
= control target key end

     0   :  { %s525_s12 = smov 0   ;;  %s527_s13 = smov 0   ;;  %s567_s0 = inlined_call_operand.vmem [shape: f32[16,32], index: 0, kind: input, shape index: {}]   ;;  %s568_s1 = inlined_call_operand.vmem [shape: bf16[4,32,8], index: 1, kind: input, shape index: {}]   ;;  %s569_s2 = inlined_call_operand.vmem [shape: f32[4,1,8], index: 2, kind: input, shape index: {}]   ;;  %s570_s3 = inlined_call_operand.vmem [shape: bf16[4,16,8], index: 3, kind: output, shape index: {}]  }
   0x1   :  { %s529_s14 = smov 0  }
   0x2 LB: > { %s22_s15 = sadd.s32 1, %s497_s13  ;;  %p423_p0 = scmp.ge.s32.totalorder %s501_s14, 1  ;;  %s501_s14 = sphi %s529_s14, %s13_s14   ;;  %s497_s13 = sphi %s527_s13, %s572_s13   ;;  %s493_s12 = sphi %s525_s12, %s571_s12  }
   0x3   : > { %p23_p1 = scmp.ge.s32.totalorder %s22_s15, 4  ;;  %p170_p2 = scmp.lt.s32.totalorder %s501_s14, 5 }
   0x5   : > { %s574_s15 = smov (%p23_p1, %s22_s15), 0  ;;  %p171_p3 = pnand %p423_p0, %p170_p2 }
   0x6   : > { %p212_p4 = scmp.lt.s32.totalorder (!%p171_p3), %s493_s12, 3 }
   0x7   : > { %174 = sbr.rel (%p171_p3) target bundleno = 225 (0xe1), region = 32 }
   0xc   : > { %v503_v0 = vmov 0.0   ;;  %vm504_vm0 = vmmov 0   ;;  %s576_s12 = smov (!%p212_p4, %s493_s12), 3  ;;  %v231_v3 = vld [vmem:[%s567_s0] sm:$0xff]  ;;  %v232_v4 = vld [vmem:[%s567_s0 + $0x8] sm:$0xff]  ;;  %vm257_vm1 = vcmask 261120  }
   0xd   : > { %443 = vmatprep.subr.bf16.mxu0 %v503_v0  ;;  %447 = vmatprep.mubr.msk.bf16.mxu0 %vm504_vm0, %v503_v0  ;;  %s436_s16 = sshll.u32 %s576_s12, 4  ;;  %v233_v5 = vpack.c.bf16 %v232_v4, %v231_v3  ;;  %s219_s26 = scalar_lea.vmem %s569_s2, %s576_s12  ;;  %vm310_vm2 = vcmask 60416  }
   0xe   : > { %s216_s19 = scalar_lea.vmem %s568_s1, %s436_s16  ;;  %v428_v6 = vld [vmem:[%s219_s26] ss:$0 sm:$0xff]  ;;  %s437_s27 = sshll.u32 %s576_s12, 3 }
   0xf   : > { %v477_v1 = vld [vmem:[%s216_s19 + $0x8] sm:$0xff]   ;;  %v478_v2 = vld [vmem:[%s216_s19] sm:$0xff]   ;;  %s228_s30 = scalar_lea.vmem %s570_s3, %s437_s27 }
  0x10   : > { %444 = vmatpush3.bf16.msra.mxu0 %v477_v1 }
  0x11   : > { %445 = vmatprep.subr.bf16.mxu0 %v503_v0 }
  0x14   : > { %446 = vmatpush3.bf16.msra.mxu0 %v478_v2 }
  0x17   : > { %448 = vmatmul.mubr.msk.bf16.vlgmr.msra.gmra.mxu0 %vm257_vm1, %v233_v5 }
  0xd7   : > { %v295_v7 = vpop.f32.mrf.mxu0 }
  0xd8   : > { %v296_v8 = vadd.f32 %v428_v6, %v295_v7 }
  0xd9   : > { %v449_v9 = vpop.f32.mrf.mxu0 }
  0xda   : > { %v438_v10 = vpack.c.bf16 %v296_v8, %v296_v8 }
  0xdb   : > { %v298_v11 = vpop.f32.mrf.mxu0 }
  0xdc   : > { %311 = vst.msk [vmem:[%s228_s30] sm:$0xf] %vm310_vm2, %v438_v10  ;;  %v299_v12 = vadd.f32 %v428_v6, %v298_v11 }
  0xdd   : > { %v450_v13 = vpop.f32.mrf.mxu0 }
  0xde   : > { %v439_v14 = vpack.c.bf16 %v299_v12, %v299_v12 }
  0xe0   : > { %312 = vst.msk [vmem:[%s228_s30 + $0x4] sm:$0xf] %vm310_vm2, %v439_v14 }
  0xe1 PF: > { %s13_s14 = sadd.s32 1, %s501_s14   ;;  %s571_s12 = smov %s497_s13 }
  0xe2   : > { %p10_p5 = scmp.ge.s32.totalorder %s13_s14, 6   ;;  %s572_s13 = smov %s574_s15 }
  0xe4   :  { %12 = sbr.rel (!%p10_p5) target bundleno = 2 (0x2), region = 68 }

// kernel: reprogramming_layer_forward.5
= control target key start
LH: loop header
LB: loop body
LE: loop exit
PB: predicated region body
PF: predicated region fallthrough
CT: control target
= control target key end

     0   :  { %s551_s12 = smov 0   ;;  %s553_s13 = smov 0   ;;  %s593_s0 = inlined_call_operand.vmem [shape: f32[16,64], index: 0, kind: input, shape index: {}]   ;;  %s594_s1 = inlined_call_operand.vmem [shape: bf16[4,64,8], index: 1, kind: input, shape index: {}]   ;;  %s595_s2 = inlined_call_operand.vmem [shape: f32[4,1,8], index: 2, kind: input, shape index: {}]   ;;  %s596_s3 = inlined_call_operand.vmem [shape: bf16[4,16,8], index: 3, kind: output, shape index: {}]  }
   0x1   :  { %s555_s14 = smov 0  }
   0x2 LB: > { %s22_s15 = sadd.s32 1, %s523_s13  ;;  %p439_p0 = scmp.ge.s32.totalorder %s527_s14, 1  ;;  %s527_s14 = sphi %s555_s14, %s13_s14   ;;  %s523_s13 = sphi %s553_s13, %s598_s13   ;;  %s519_s12 = sphi %s551_s12, %s597_s12  }
   0x3   : > { %p23_p1 = scmp.ge.s32.totalorder %s22_s15, 4  ;;  %p170_p2 = scmp.lt.s32.totalorder %s527_s14, 5 }
   0x5   : > { %s600_s15 = smov (%p23_p1, %s22_s15), 0  ;;  %p171_p3 = pnand %p439_p0, %p170_p2 }
   0x6   : > { %p212_p4 = scmp.lt.s32.totalorder (!%p171_p3), %s519_s12, 3 }
   0x7   : > { %174 = sbr.rel (%p171_p3) target bundleno = 233 (0xe9), region = 32 }
   0xc   : > { %v529_v0 = vmov 0.0   ;;  %vm530_vm0 = vmmov 0   ;;  %s602_s12 = smov (!%p212_p4, %s519_s12), 3  ;;  %v231_v5 = vld [vmem:[%s593_s0] sm:$0xff]  ;;  %v232_v6 = vld [vmem:[%s593_s0 + $0x8] sm:$0xff]  ;;  %vm273_vm1 = vcmask 523264  }
   0xd   : > { %463 = vmatprep.subr.bf16.mxu0 %v529_v0  ;;  %471 = vmatprep.mubr.msk.bf16.mxu0 %vm530_vm0, %v529_v0  ;;  %s454_s16 = sshll.u32 %s602_s12, 5  ;;  %v233_v7 = vpack.c.bf16 %v232_v6, %v231_v5  ;;  %s219_s26 = scalar_lea.vmem %s595_s2, %s602_s12  ;;  %vm326_vm2 = vcmask 60416  }
   0xe   : > { %s216_s19 = scalar_lea.vmem %s594_s1, %s454_s16  ;;  %v444_v8 = vld [vmem:[%s219_s26] ss:$0 sm:$0xff]  ;;  %s455_s27 = sshll.u32 %s602_s12, 3 }
   0xf   : > { %v501_v1 = vld [vmem:[%s216_s19 + $0x18] sm:$0xff]   ;;  %v502_v2 = vld [vmem:[%s216_s19 + $0x10] sm:$0xff]   ;;  %v503_v3 = vld [vmem:[%s216_s19 + $0x8] sm:$0xff]   ;;  %s228_s30 = scalar_lea.vmem %s596_s3, %s455_s27 }
  0x10   : > { %464 = vmatpush3.bf16.msra.mxu0 %v501_v1  ;;  %v504_v4 = vld [vmem:[%s216_s19] sm:$0xff]  }
  0x11   : > { %465 = vmatprep.subr.bf16.mxu0 %v529_v0 }
  0x14   : > { %466 = vmatpush3.bf16.msra.mxu0 %v502_v2 }
  0x15   : > { %467 = vmatprep.subr.bf16.mxu0 %v529_v0 }
  0x18   : > { %468 = vmatpush3.bf16.msra.mxu0 %v503_v3 }
  0x19   : > { %469 = vmatprep.subr.bf16.mxu0 %v529_v0 }
  0x1c   : > { %470 = vmatpush3.bf16.msra.mxu0 %v504_v4 }
  0x1f   : > { %472 = vmatmul.mubr.msk.bf16.vlgmr.msra.gmra.mxu0 %vm273_vm1, %v233_v7 }
  0xdf   : > { %v311_v9 = vpop.f32.mrf.mxu0 }
  0xe0   : > { %v312_v10 = vadd.f32 %v444_v8, %v311_v9 }
  0xe1   : > { %v473_v11 = vpop.f32.mrf.mxu0 }
  0xe2   : > { %v456_v12 = vpack.c.bf16 %v312_v10, %v312_v10 }
  0xe3   : > { %v314_v13 = vpop.f32.mrf.mxu0 }
  0xe4   : > { %327 = vst.msk [vmem:[%s228_s30] sm:$0xf] %vm326_vm2, %v456_v12  ;;  %v315_v14 = vadd.f32 %v444_v8, %v314_v13 }
  0xe5   : > { %v474_v15 = vpop.f32.mrf.mxu0 }
  0xe6   : > { %v457_v16 = vpack.c.bf16 %v315_v14, %v315_v14 }
  0xe8   : > { %328 = vst.msk [vmem:[%s228_s30 + $0x4] sm:$0xf] %vm326_vm2, %v457_v16 }
  0xe9 PF: > { %s13_s14 = sadd.s32 1, %s527_s14   ;;  %s597_s12 = smov %s523_s13 }
  0xea   : > { %p10_p5 = scmp.ge.s32.totalorder %s13_s14, 6   ;;  %s598_s13 = smov %s600_s15 }
  0xec   :  { %12 = sbr.rel (!%p10_p5) target bundleno = 2 (0x2), region = 68 }

// kernel: reprogramming_layer_forward.7
= control target key start
LH: loop header
LB: loop body
LE: loop exit
PB: predicated region body
PF: predicated region fallthrough
CT: control target
= control target key end

     0   :  { %10 = vsyncpa [#allocation4], 0  ;;  %s812_s18 = smov 0   ;;  %s814_s19 = smov 0   ;;  %s906_s0 = inlined_call_operand.vmem [shape: bf16[4,16,8], index: 0, kind: input, shape index: {}]   ;;  %s907_s1 = inlined_call_operand.vmem [shape: bf16[4,16,8], index: 1, kind: input, shape index: {}]   ;;  %s908_s2 = inlined_call_operand.vmem [shape: bf16[4,16,8], index: 2, kind: input, shape index: {}]   ;;  %s909_s3 = inlined_call_operand.vmem [shape: bf16[4,8,64], index: 3, kind: input, shape index: {}]   ;;  %s910_s4 = inlined_call_operand.vmem [shape: f32[1,64], index: 4, kind: input, shape index: {}]   ;;  %s911_s5 = inlined_call_operand.hbm [shape: f32[16,64], index: 5, kind: output, shape index: {}]  }
   0x1   :  { %s816_s20 = smov 0  }
   0x2 LB: > { %s626_s21 = sadd.s32 4294967295, %s774_s20   ;;  %s25_s22 = sadd.s32 1, %s770_s19  ;;  %s774_s20 = sphi %s816_s20, %s16_s20   ;;  %s770_s19 = sphi %s814_s19, %s914_s19   ;;  %s766_s18 = sphi %s812_s18, %s913_s18  }
   0x3   : > { %p26_p0 = scmp.ge.s32.totalorder %s25_s22, 4  ;;  %p629_p1 = scmp.ge.s32.totalorder %s774_s20, 1 }
   0x4   : > { %p236_p2 = scmp.lt.s32.totalorder %s774_s20, 5 }
   0x5   : > { %s916_s22 = smov (%p26_p0, %s25_s22), 0 }
   0x6   : > { %p237_p3 = pnand %p629_p1, %p236_p2 }
   0x7   : > { %p278_p4 = scmp.lt.s32.totalorder (!%p237_p3), %s766_s18, 3  ;;  %p637_p5 = scmp.ne.s32.totalorder (!%p237_p3), %s766_s18, 0 }
   0x8   : > { %240 = sbr.rel (%p237_p3) target bundleno = 967 (0x3c7), region = 40 }
   0xd   : > { %s279_s23 = scalar_select %p278_p4, %s766_s18, 3 }
   0xe   : > { %306 = sbr.rel (%p637_p5) target bundleno = 21 (0x15), region = 44 }
   0xf   : > { %s835_s24 = sshll.u32 %s279_s23, 3  ;;  %s636_s25 = sshll.u32 %s279_s23, 2 }
  0x10   : > { %s285_s28 = scalar_lea.vmem %s906_s0, %s835_s24  ;;  %s291_s6 = scalar_lea.vmem %s907_s1, %s835_s24 }
  0x11   : > { %s296_s9 = scalar_lea.vmem %s908_s2, %s835_s24  ;;  %s852_s12 = scalar_lea.vmem %s909_s3, %s636_s25 }
  0x13   : > { %vm307_vm0 = vcmask 523264   ;;  %v776_v0 = vmov 0.0  }
  0x14   : > { %308 = vst.msk [vmem:[#allocation2] sm:$0xff] %vm307_vm0, %v776_v0  ;;  %309 = vst.msk [vmem:[#allocation2 + $0x8] sm:$0xff] %vm307_vm0, %v776_v0 }
  0x15 PF: > { %v713_v1 = vld [vmem:[%s291_s6] sm:$0xff]   ;;  %v777_v2 = vmov 0.0   ;;  %vm326_vm1 = vcmask 64512   ;;  %vm778_vm2 = vmmov 0   ;;  %vm374_vm3 = vcmask 130048   ;;  %p644_p6 = scmp.ne.s32.totalorder %s766_s18, 3 }
  0x16   : > { %659 = vmatprep.subr.bf16.mxu0 %v777_v2  ;;  %665 = vmatprep.subr.bf16.mxu1 %v777_v2  ;;  %v331_v3 = vsel %vm326_vm1, %v713_v1, 0  ;;  %v714_v4 = vld [vmem:[%s285_s28] sm:$0xff]   ;;  %vm455_vm4 = vcmask 1043456   ;;  %vm502_vm5 = vcmask 523264  }
  0x17   : > { %661 = vmatprep.mubr.msk.bf16.mxu0 %vm778_vm2, %v777_v2  ;;  %667 = vmatprep.mubr.msk.bf16.mxu1 %vm778_vm2, %v777_v2  ;;  %v715_v21 = vld [vmem:[%s296_s9] sm:$0xff]  }
  0x18   : > { %660 = vmatpush3.bf16.xpose.msra.mxu0 %v331_v3  ;;  %666 = vmatpush3.bf16.msra.mxu1 %v715_v21  ;;  %v451_v26 = vld [vmem:[%s852_s12] sm:$0xf] }
  0x19   : > { %671 = vmatprep.subr.bf16.mxu1 %v777_v2  ;;  %v457_v30 = vsel %vm455_vm4, %v451_v26, 0 }
  0x1b   : > { %v448_v36 = vld [vmem:[#allocation2] sm:$0xff]  ;;  %v449_v40 = vld [vmem:[#allocation2 + $0x8] sm:$0xff] }
  0x1f   : > { %662 = vmatmul.mubr.msk.bf16.vlgmr.msra.gmra.mxu0 %vm326_vm1, %v714_v4 }
  0xdf   : > { %v367_v5 = vpop.f32.mrf.mxu0 }
  0xe0   : > { %v375_v6 = vsel %vm374_vm3, %v367_v5, -inf }
  0xe1   : > { %376 = vmax.xlane.f32.xlu0 %v375_v6  ;;  %v663_v7 = vpop.f32.mrf.mxu0 }
  0xe3   : > { %v370_v8 = vpop.f32.mrf.mxu0 }
  0xe4   : > { %v378_v9 = vsel %vm374_vm3, %v370_v8, -inf }
  0xe5   : > { %379 = vmax.xlane.f32.xlu0 %v378_v9  ;;  %v664_v10 = vpop.f32.mrf.mxu0 }
 0x16a   : > { %v377_v11 = vpop.xlane.xlu0 %376 }
 0x16b   : > { %v381_v12 = vsub.f32 %v367_v5, %v377_v11 }
 0x16d   : > { %v383_v13 = vmul.f32 1.442695, %v381_v12 }
 0x16e   : > { %v380_v14 = vpop.xlane.xlu0 %379 }
 0x16f   : > { %716 = vpow2.f32 %v383_v13  ;;  %v382_v15 = vsub.f32 %v370_v8, %v380_v14 }
 0x171   : > { %v385_v16 = vmul.f32 1.442695, %v382_v15 }
 0x173   : > { %718 = vpow2.f32 %v385_v16 }
 0x17c   : > { %v717_v17 = vpop.eup %716 }
 0x17d   : > { %v387_v18 = vsel %vm374_vm3, %v717_v17, 0.0 }
 0x17e   : > { %388 = vadd.xlane.f32.xlu1 %v387_v18 }
 0x180   : > { %v719_v19 = vpop.eup %718 }
 0x181   : > { %v390_v20 = vsel %vm374_vm3, %v719_v19, 0.0 }
 0x182   : > { %391 = vadd.xlane.f32.xlu1 %v390_v20 }
 0x207   : > { %v389_v22 = vpop.xlane.xlu1 %388 }
 0x208   : > { %720 = vrcp.f32 %v389_v22 }
 0x20b   : > { %v392_v23 = vpop.xlane.xlu1 %391 }
 0x20c   : > { %722 = vrcp.f32 %v392_v23 }
 0x215   : > { %v721_v24 = vpop.eup %720 }
 0x216   : > { %v395_v27 = vmul.f32 %v721_v24, %v717_v17 }
 0x219   : > { %v723_v25 = vpop.eup %722 }
 0x21a   : > { %v396_v28 = vmul.f32 %v723_v25, %v719_v19 }
 0x21c   : > { %v397_v29 = vpack.c.bf16 %v396_v28, %v395_v27 }
 0x21e   : > { %668 = vmatmul.mubr.msk.bf16.vlgmr.msra.gmra.mxu1 %vm374_vm3, %v397_v29 }
 0x21f   : > { %672 = vmatpush3.bf16.msra.mxu1 %v457_v30  ;;  %673 = vmatprep.mubr.msk.bf16.mxu1 %vm778_vm2, %v777_v2 }
 0x2de   : > { %v441_v31 = vpop.f32.mrf.mxu1 }
 0x2e0   : > { %v669_v32 = vpop.f32.mrf.mxu1 }
 0x2e2   : > { %v444_v33 = vpop.f32.mrf.mxu1 }
 0x2e3   : > { %v450_v34 = vpack.c.bf16 %v444_v33, %v441_v31 }
 0x2e4   : > { %v670_v35 = vpop.f32.mrf.mxu1 }
 0x2e5   : > { %674 = vmatmul.mubr.msk.bf16.vlgmr.msra.gmra.mxu1 %vm326_vm1, %v450_v34 }
 0x3a5   : > { %v493_v37 = vpop.f32.mrf.mxu1 }
 0x3a6   : > { %v500_v38 = vadd.f32 %v493_v37, %v448_v36 }
 0x3a7   : > { %v675_v39 = vpop.f32.mrf.mxu1 }
 0x3a8   : > { %503 = vst.msk [vmem:[#allocation2] sm:$0xff] %vm502_vm5, %v500_v38  ;;  %508 = sbr.rel (%p644_p6) target bundleno = 951 (0x3b7), region = 48 }
 0x3a9   : > { %v496_v41 = vpop.f32.mrf.mxu1 }
 0x3aa   : > { %v501_v42 = vadd.f32 %v496_v41, %v449_v40 }
 0x3ab   : > { %v676_v43 = vpop.f32.mrf.mxu1 }
 0x3ac   : > { %504 = vst.msk [vmem:[#allocation2 + $0x8] sm:$0xff] %vm502_vm5, %v501_v42 }
 0x3ad   : > { %v645_v45 = vld [vmem:[%s910_s4] ss:$0 sm:$0xff] }
 0x3af   : > { %v509_v44 = vld [vmem:[#allocation2] sm:$0xff] }
 0x3b0   : > { %v518_v47 = vadd.f32 %v645_v45, %v509_v44 }
 0x3b2   : > { %520 = vst.msk [vmem:[#allocation3] sm:$0xff] %vm502_vm5, %v518_v47 }
 0x3b3   : > { %v510_v46 = vld [vmem:[#allocation2 + $0x8] sm:$0xff] }
 0x3b4   : > { %v519_v48 = vadd.f32 %v645_v45, %v510_v46 }
 0x3b6   : > { %521 = vst.msk [vmem:[#allocation3 + $0x8] sm:$0xff] %vm502_vm5, %v519_v48 }
 0x3b7 PF: > { %p882_p7 = scmp.eq.s32.totalorder %s626_s21, 3  ;;  %s779_s18 = smov [#allocation3]  }
 0x3b8   : > { %s531_s23 = sshll.u32 %s779_s18, 4  ;;  %s532_s23 = int_to_ptr.vmem [resolvable:$true] %s531_s23 }
 0x3b9   : > { %s724_s24 = scalar_lea.vmem %s532_s23, 256  ;;  %p731_p11 = scmp.lt.s32.totalorder %s532_s23, %s532_s23 }
 0x3ba   : > { %p725_p8 = scmp.ne.s32.totalorder %s532_s23, %s724_s24  ;;  %p732_p12 = scmp.lt.s32.totalorder %s724_s24, %s724_s24 }
 0x3bc   : > { %p726_p9 = pnand %p725_p8, %p882_p7  ;;  %p733_p13 = por %p732_p12, %p731_p11 }
 0x3be   : > { %p727_p10 = pneg %p726_p9 }
 0x3c0   : > { %p734_p0 = pnand %p733_p13, %p727_p10 }
 0x3c2   : > { %737 = shalt.err (!%p734_p0)
}
 0x3c3   : > { %s780_s25 = smov 128   ;;  %s781_s21 = smov 8  }
 0x3c4   : > { %678 = dma.vmem_to_hbm [thread:$0]  (%p882_p7), %s532_s23, 256, %s911_s5, [#allocation4], %s780_s25, %s780_s25, %s781_s21  }
 0x3c5   : > { %761 = dma.done.wait (%p882_p7), [#allocation4], 256  }
 0x3c6   : > { %763 = vsyncadd (%p882_p7), [#allocation4], 4294967040 }
 0x3c7 PF: > { %s16_s20 = sadd.s32 1, %s774_s20   ;;  %s913_s18 = smov %s770_s19 }
 0x3c8   : > { %p13_p1 = scmp.ge.s32.totalorder %s16_s20, 6   ;;  %s914_s19 = smov %s916_s22 }
 0x3ca   :  { %15 = sbr.rel (!%p13_p1) target bundleno = 2 (0x2), region = 85 }
 0x3cf   :  { %547 = vsyncpa [#allocation4], 1 }
 0x3d0   :  { %549 = vsyncpa [#allocation4 + $0x1], 1 }

</bundles_post_ra>
